<compile_context>
chip_gen: v7x
topology: tpu7x:2x2x1
jax: 0.10.0
libtpu: 0.0.40
codegen_flags: <defaults>
</compile_context>

<pallas_src>
import functools
import math

import jax
import jax.numpy as jnp
from jax import lax
from jax.experimental import pallas as pl
from jax.experimental.pallas import tpu as pltpu


def _fused_sort_mlp_kernel(x_ref, w_ref, b_ref, o_ref):
    """sort(x, -1) -> Linear -> ReLU -> Linear -> ReLU -> Linear, all in VMEM.

    x_ref : (tb, n)    raw (int or float) load vectors
    w_ref : (3, P, P)  packed, pre-transposed, zero-padded weights
    b_ref : (3, P)     packed, zero-padded biases
    o_ref : (tb, O)    output logits
    """
    x = x_ref[...].astype(jnp.float32)          # (tb, n)
    tb, n = x.shape
    P = w_ref.shape[-1]
    O = o_ref.shape[-1]

    # ---------------- fused ascending sort along the feature axis ----------
    # Odd-even transposition network, n phases.  Right/left neighbours are
    # obtained via constant shift matrices on the MXU; boundaries are handled
    # with +/-BIG sentinels so every column is a (possibly no-op) compare-
    # exchange.  No HBM traffic, no extra kernel launch.
    if n > 1:
        col = lax.broadcasted_iota(jnp.int32, (tb, n), 1)
        first_if_even_phase = (col % 2) == 0
        is_last_col = col == (n - 1)
        is_first_col = col == 0

        rr = lax.broadcasted_iota(jnp.int32, (n, n), 0)
        cc = lax.broadcasted_iota(jnp.int32, (n, n), 1)
        shift_from_right = (rr == cc + 1).astype(jnp.float32)  # (x@S)[:,c]=x[:,c+1]
        shift_from_left = (rr == cc - 1).astype(jnp.float32)   # (x@S)[:,c]=x[:,c-1]
        big = jnp.float32(1e30)

        for phase in range(n):                       # unrolled at trace time
            right = jnp.dot(x, shift_from_right,
                            preferred_element_type=jnp.float32)
            right = jnp.where(is_last_col, big, right)
            left = jnp.dot(x, shift_from_left,
                           preferred_element_type=jnp.float32)
            left = jnp.where(is_first_col, -big, left)
            is_first = (first_if_even_phase if phase % 2 == 0
                        else jnp.logical_not(first_if_even_phase))
            x = jnp.where(is_first, jnp.minimum(x, right),
                          jnp.maximum(x, left))

    # ---------------- fused 3-layer MLP -------------------------------------
    b_all = b_ref[...]                          # (3, P)

    w0 = w_ref[0]                               # (P, P)
    if n < P:
        w0 = w0[:n, :]                          # only the valid input rows

    h = jnp.dot(x, w0, preferred_element_type=jnp.float32) + b_all[0:1, :]
    h = jnp.maximum(h, 0.0)
    h = jnp.dot(h, w_ref[1], preferred_element_type=jnp.float32) + b_all[1:2, :]
    h = jnp.maximum(h, 0.0)
    out = jnp.dot(h, w_ref[2], preferred_element_type=jnp.float32) + b_all[2:3, :]

    o_ref[...] = out[:, :O] if O < P else out


def pack_params(params):
    """One-time prep (NOT on the hot path): transpose torch (out,in) weights to
    (in,out), zero-pad to a common square width P and stack weights / biases
    into a single tensor each.  Zero padding is exact: padded rows/cols only
    ever multiply or add zeros."""
    w1, b1 = params["w1"], params["b1"]          # (I1, n), (I1,)
    w2, b2 = params["w2"], params["b2"]          # (I2, I1), (I2,)
    w3, b3 = params["w3"], params["b3"]          # (O,  I2), (O,)
    I1, n = w1.shape
    I2 = w2.shape[0]
    O = int(w3.shape[0])
    P = max(n, I1, I2, O)

    W = jnp.zeros((3, P, P), jnp.float32)
    W = W.at[0, :n, :I1].set(jnp.transpose(w1).astype(jnp.float32))
    W = W.at[1, :I1, :I2].set(jnp.transpose(w2).astype(jnp.float32))
    W = W.at[2, :I2, :O].set(jnp.transpose(w3).astype(jnp.float32))

    b = jnp.zeros((3, P), jnp.float32)
    b = b.at[0, :I1].set(b1.astype(jnp.float32))
    b = b.at[1, :I2].set(b2.astype(jnp.float32))
    b = b.at[2, :O].set(b3.astype(jnp.float32))
    return W, b, O


def _pick_batch_tile(B):
    if B <= 1024:
        return B                   # single block; a grid would only add overhead
    for tb in (4096, 2048, 1024, 512, 256, 128, 64, 32, 16, 8):
        if B % tb == 0:
            return tb
    return B


@functools.partial(jax.jit, static_argnames=("out_features",))
def full_two_thinning_net(x, W, b, out_features):
    """x: (B, n) int or float load vectors. Returns (B, out_features) float32."""
    B, n = x.shape
    P = W.shape[-1]
    tb = _pick_batch_tile(B)

    return pl.pallas_call(
        _fused_sort_mlp_kernel,
        out_shape=jax.ShapeDtypeStruct((B, out_features), jnp.float32),
        grid=(B // tb,),
        in_specs=[
            pl.BlockSpec((tb, n), lambda i: (i, 0)),
            pl.BlockSpec((3, P, P), lambda i: (0, 0, 0)),   # VMEM-resident weights
            pl.BlockSpec((3, P), lambda i: (0, 0)),          # VMEM-resident biases
        ],
        out_specs=pl.BlockSpec((tb, out_features), lambda i: (i, 0)),
        compiler_params=pltpu.CompilerParams(
            dimension_semantics=("parallel",)),
    )(x, W, b)


def reference_forward(x, params):
    """Pure-JAX reference mirroring the PyTorch forward (float32)."""
    w1 = params["w1"].astype(jnp.float32); b1 = params["b1"].astype(jnp.float32)
    w2 = params["w2"].astype(jnp.float32); b2 = params["b2"].astype(jnp.float32)
    w3 = params["w3"].astype(jnp.float32); b3 = params["b3"].astype(jnp.float32)
    xs = jnp.sort(x.astype(jnp.float32), axis=-1)
    h1 = jnp.maximum(xs @ w1.T + b1, 0.0)
    h2 = jnp.maximum(h1 @ w2.T + b2, 0.0)
    return h2 @ w3.T + b3


if __name__ == "__main__":
    # Shapes consistent with the module defaults.
    n = 8                      # number of bins (input features)
    max_threshold = 7          # -> output size 8
    batch = 2

    inner1 = max(max_threshold + 1, n // 2)        # = 8
    inner2 = max(max_threshold + 1, inner1 // 2)   # = 8
    O = max_threshold + 1                          # = 8

    key = jax.random.PRNGKey(0)
    k_w1, k_b1, k_w2, k_b2, k_w3, k_b3, k_x = jax.random.split(key, 7)

    def uinit(k, shape, fan_in):
        bound = 1.0 / math.sqrt(fan_in)
        return jax.random.uniform(k, shape, jnp.float32, -bound, bound)

    params = {
        "w1": uinit(k_w1, (inner1, n), n),
        "b1": uinit(k_b1, (inner1,), n),
        "w2": uinit(k_w2, (inner2, inner1), inner1),
        "b2": uinit(k_b2, (inner2,), inner1),
        "w3": uinit(k_w3, (O, inner2), inner2),
        "b3": uinit(k_b3, (O,), inner2),
    }

    # One-time parameter packing (hoisted off the per-call hot path).
    W_packed, b_packed, out_features = pack_params(params)

    # Integer load vectors in [0, 10), like the RL environment produces.
    x = jax.random.randint(k_x, (batch, n), 0, 10, dtype=jnp.int32)

    out = full_two_thinning_net(x, W_packed, b_packed, out_features=out_features)
    out = jax.block_until_ready(out)

    ref = reference_forward(x, params)
    assert out.shape == (batch, O), (out.shape, (batch, O))
    assert jnp.allclose(out, ref, rtol=1e-5, atol=1e-5), (out, ref)

    print("KERNEL_OK")
</pallas_src>

<mosaic_0001>
module attributes {stable_mosaic.version = 11 : i64} {
  func.func @_fused_sort_mlp_kernel(%arg0: i32, %arg1: memref<2x8xi32, #tpu.memory_space<vmem>>, %arg2: memref<3x8x8xf32, #tpu.memory_space<vmem>>, %arg3: memref<3x8xf32, #tpu.memory_space<vmem>>, %arg4: memref<2x8xf32, #tpu.memory_space<vmem>>) attributes {dimension_semantics = [#tpu.dimension_semantics<parallel>], iteration_bounds = array<i64: 1>, scalar_prefetch = 0 : i64, scratch_operands = 0 : i64, tpu.core_type = #tpu.core_type<tc>, window_params = [{transform_indices = @transform_0, window_bounds = array<i64: 2, 8>}, {pipeline_mode = #tpu.pipeline_mode<synchronous>, transform_indices = @transform_1, window_bounds = array<i64: 3, 8, 8>}, {pipeline_mode = #tpu.pipeline_mode<synchronous>, transform_indices = @transform_2, window_bounds = array<i64: 3, 8>}, {transform_indices = @transform_3, window_bounds = array<i64: 2, 8>}]} {
    %c0 = arith.constant 0 : index
    %c0_0 = arith.constant 0 : index
    %0 = vector.load %arg1[%c0, %c0_0] : memref<2x8xi32, #tpu.memory_space<vmem>>, vector<2x8xi32>
    %1 = arith.sitofp %0 : vector<2x8xi32> to vector<2x8xf32>
    %2 = tpu.iota {dimensions = array<i32: 1>} : vector<2x8xi32>
    %c2_i32 = arith.constant 2 : i32
    %c0_i32 = arith.constant 0 : i32
    %3 = arith.cmpi eq, %c2_i32, %c0_i32 : i32
    %c1_i32 = arith.constant 1 : i32
    %4 = arith.select %3, %c1_i32, %c2_i32 : i32
    %5 = vector.broadcast %4 : i32 to vector<2x8xi32>
    %6 = arith.remsi %2, %5 : vector<2x8xi32>
    %c0_i32_1 = arith.constant 0 : i32
    %7 = vector.broadcast %c0_i32_1 : i32 to vector<2x8xi32>
    %8 = arith.cmpi ne, %6, %7 : vector<2x8xi32>
    %c0_i32_2 = arith.constant 0 : i32
    %9 = vector.broadcast %c0_i32_2 : i32 to vector<2x8xi32>
    %10 = arith.cmpi slt, %6, %9 : vector<2x8xi32>
    %c0_i32_3 = arith.constant 0 : i32
    %11 = arith.cmpi slt, %4, %c0_i32_3 : i32
    %12 = vector.broadcast %11 : i1 to vector<2x8xi1>
    %13 = vector.broadcast %12 : vector<2x8xi1> to vector<2x8xi1>
    %14 = arith.xori %10, %13 : vector<2x8xi1>
    %15 = arith.andi %14, %8 : vector<2x8xi1>
    %16 = vector.broadcast %4 : i32 to vector<2x8xi32>
    %17 = arith.addi %6, %16 : vector<2x8xi32>
    %18 = arith.select %15, %17, %6 : vector<2x8xi1>, vector<2x8xi32>
    %c0_i32_4 = arith.constant 0 : i32
    %19 = vector.broadcast %c0_i32_4 : i32 to vector<2x8xi32>
    %20 = arith.cmpi eq, %18, %19 : vector<2x8xi32>
    %c7_i32 = arith.constant 7 : i32
    %21 = vector.broadcast %c7_i32 : i32 to vector<2x8xi32>
    %22 = arith.cmpi eq, %2, %21 : vector<2x8xi32>
    %c0_i32_5 = arith.constant 0 : i32
    %23 = vector.broadcast %c0_i32_5 : i32 to vector<2x8xi32>
    %24 = arith.cmpi eq, %2, %23 : vector<2x8xi32>
    %25 = tpu.iota {dimensions = array<i32: 0>} : vector<8x8xi32>
    %26 = tpu.iota {dimensions = array<i32: 1>} : vector<8x8xi32>
    %c1_i32_6 = arith.constant 1 : i32
    %27 = vector.broadcast %c1_i32_6 : i32 to vector<8x8xi32>
    %28 = arith.addi %26, %27 : vector<8x8xi32>
    %29 = arith.cmpi eq, %25, %28 : vector<8x8xi32>
    %30 = arith.extui %29 : vector<8x8xi1> to vector<8x8xi32>
    %31 = arith.sitofp %30 : vector<8x8xi32> to vector<8x8xf32>
    %c1_i32_7 = arith.constant 1 : i32
    %32 = vector.broadcast %c1_i32_7 : i32 to vector<8x8xi32>
    %33 = arith.subi %26, %32 : vector<8x8xi32>
    %34 = arith.cmpi eq, %25, %33 : vector<8x8xi32>
    %35 = arith.extui %34 : vector<8x8xi1> to vector<8x8xi32>
    %36 = arith.sitofp %35 : vector<8x8xi32> to vector<8x8xf32>
    %cst = arith.constant dense<0.000000e+00> : vector<2x8xf32>
    %37 = tpu.matmul %1, %31, %cst {dimension_numbers = #tpu.dot_dimension_numbers<[1], [0], [0], [1], [0, 0, 1, 1], [], []>} : vector<2x8xf32>, vector<8x8xf32>, vector<2x8xf32> -> vector<2x8xf32>
    %cst_8 = arith.constant 1.000000e+30 : f32
    %38 = vector.broadcast %cst_8 : f32 to vector<2x8xf32>
    %39 = arith.select %22, %38, %37 : vector<2x8xi1>, vector<2x8xf32>
    %cst_9 = arith.constant dense<0.000000e+00> : vector<2x8xf32>
    %40 = tpu.matmul %1, %36, %cst_9 {dimension_numbers = #tpu.dot_dimension_numbers<[1], [0], [0], [1], [0, 0, 1, 1], [], []>} : vector<2x8xf32>, vector<8x8xf32>, vector<2x8xf32> -> vector<2x8xf32>
    %cst_10 = arith.constant 0.000000e+00 : f32
    %cst_11 = arith.constant 1.000000e+30 : f32
    %41 = arith.subf %cst_10, %cst_11 : f32
    %42 = vector.broadcast %41 : f32 to vector<2x8xf32>
    %43 = arith.select %24, %42, %40 : vector<2x8xi1>, vector<2x8xf32>
    %44 = arith.minimumf %1, %39 : vector<2x8xf32>
    %45 = arith.maximumf %1, %43 : vector<2x8xf32>
    %46 = arith.select %20, %44, %45 : vector<2x8xi1>, vector<2x8xf32>
    %cst_12 = arith.constant dense<0.000000e+00> : vector<2x8xf32>
    %47 = tpu.matmul %46, %31, %cst_12 {dimension_numbers = #tpu.dot_dimension_numbers<[1], [0], [0], [1], [0, 0, 1, 1], [], []>} : vector<2x8xf32>, vector<8x8xf32>, vector<2x8xf32> -> vector<2x8xf32>
    %cst_13 = arith.constant 1.000000e+30 : f32
    %48 = vector.broadcast %cst_13 : f32 to vector<2x8xf32>
    %49 = arith.select %22, %48, %47 : vector<2x8xi1>, vector<2x8xf32>
    %cst_14 = arith.constant dense<0.000000e+00> : vector<2x8xf32>
    %50 = tpu.matmul %46, %36, %cst_14 {dimension_numbers = #tpu.dot_dimension_numbers<[1], [0], [0], [1], [0, 0, 1, 1], [], []>} : vector<2x8xf32>, vector<8x8xf32>, vector<2x8xf32> -> vector<2x8xf32>
    %cst_15 = arith.constant 0.000000e+00 : f32
    %cst_16 = arith.constant 1.000000e+30 : f32
    %51 = arith.subf %cst_15, %cst_16 : f32
    %52 = vector.broadcast %51 : f32 to vector<2x8xf32>
    %53 = arith.select %24, %52, %50 : vector<2x8xi1>, vector<2x8xf32>
    %cst_17 = arith.constant dense<true> : vector<2x8xi1>
    %54 = arith.xori %20, %cst_17 : vector<2x8xi1>
    %55 = arith.minimumf %46, %49 : vector<2x8xf32>
    %56 = arith.maximumf %46, %53 : vector<2x8xf32>
    %57 = arith.select %54, %55, %56 : vector<2x8xi1>, vector<2x8xf32>
    %cst_18 = arith.constant dense<0.000000e+00> : vector<2x8xf32>
    %58 = tpu.matmul %57, %31, %cst_18 {dimension_numbers = #tpu.dot_dimension_numbers<[1], [0], [0], [1], [0, 0, 1, 1], [], []>} : vector<2x8xf32>, vector<8x8xf32>, vector<2x8xf32> -> vector<2x8xf32>
    %cst_19 = arith.constant 1.000000e+30 : f32
    %59 = vector.broadcast %cst_19 : f32 to vector<2x8xf32>
    %60 = arith.select %22, %59, %58 : vector<2x8xi1>, vector<2x8xf32>
    %cst_20 = arith.constant dense<0.000000e+00> : vector<2x8xf32>
    %61 = tpu.matmul %57, %36, %cst_20 {dimension_numbers = #tpu.dot_dimension_numbers<[1], [0], [0], [1], [0, 0, 1, 1], [], []>} : vector<2x8xf32>, vector<8x8xf32>, vector<2x8xf32> -> vector<2x8xf32>
    %cst_21 = arith.constant 0.000000e+00 : f32
    %cst_22 = arith.constant 1.000000e+30 : f32
    %62 = arith.subf %cst_21, %cst_22 : f32
    %63 = vector.broadcast %62 : f32 to vector<2x8xf32>
    %64 = arith.select %24, %63, %61 : vector<2x8xi1>, vector<2x8xf32>
    %65 = arith.minimumf %57, %60 : vector<2x8xf32>
    %66 = arith.maximumf %57, %64 : vector<2x8xf32>
    %67 = arith.select %20, %65, %66 : vector<2x8xi1>, vector<2x8xf32>
    %cst_23 = arith.constant dense<0.000000e+00> : vector<2x8xf32>
    %68 = tpu.matmul %67, %31, %cst_23 {dimension_numbers = #tpu.dot_dimension_numbers<[1], [0], [0], [1], [0, 0, 1, 1], [], []>} : vector<2x8xf32>, vector<8x8xf32>, vector<2x8xf32> -> vector<2x8xf32>
    %cst_24 = arith.constant 1.000000e+30 : f32
    %69 = vector.broadcast %cst_24 : f32 to vector<2x8xf32>
    %70 = arith.select %22, %69, %68 : vector<2x8xi1>, vector<2x8xf32>
    %cst_25 = arith.constant dense<0.000000e+00> : vector<2x8xf32>
    %71 = tpu.matmul %67, %36, %cst_25 {dimension_numbers = #tpu.dot_dimension_numbers<[1], [0], [0], [1], [0, 0, 1, 1], [], []>} : vector<2x8xf32>, vector<8x8xf32>, vector<2x8xf32> -> vector<2x8xf32>
    %cst_26 = arith.constant 0.000000e+00 : f32
    %cst_27 = arith.constant 1.000000e+30 : f32
    %72 = arith.subf %cst_26, %cst_27 : f32
    %73 = vector.broadcast %72 : f32 to vector<2x8xf32>
    %74 = arith.select %24, %73, %71 : vector<2x8xi1>, vector<2x8xf32>
    %cst_28 = arith.constant dense<true> : vector<2x8xi1>
    %75 = arith.xori %20, %cst_28 : vector<2x8xi1>
    %76 = arith.minimumf %67, %70 : vector<2x8xf32>
    %77 = arith.maximumf %67, %74 : vector<2x8xf32>
    %78 = arith.select %75, %76, %77 : vector<2x8xi1>, vector<2x8xf32>
    %cst_29 = arith.constant dense<0.000000e+00> : vector<2x8xf32>
    %79 = tpu.matmul %78, %31, %cst_29 {dimension_numbers = #tpu.dot_dimension_numbers<[1], [0], [0], [1], [0, 0, 1, 1], [], []>} : vector<2x8xf32>, vector<8x8xf32>, vector<2x8xf32> -> vector<2x8xf32>
    %cst_30 = arith.constant 1.000000e+30 : f32
    %80 = vector.broadcast %cst_30 : f32 to vector<2x8xf32>
    %81 = arith.select %22, %80, %79 : vector<2x8xi1>, vector<2x8xf32>
    %cst_31 = arith.constant dense<0.000000e+00> : vector<2x8xf32>
    %82 = tpu.matmul %78, %36, %cst_31 {dimension_numbers = #tpu.dot_dimension_numbers<[1], [0], [0], [1], [0, 0, 1, 1], [], []>} : vector<2x8xf32>, vector<8x8xf32>, vector<2x8xf32> -> vector<2x8xf32>
    %cst_32 = arith.constant 0.000000e+00 : f32
    %cst_33 = arith.constant 1.000000e+30 : f32
    %83 = arith.subf %cst_32, %cst_33 : f32
    %84 = vector.broadcast %83 : f32 to vector<2x8xf32>
    %85 = arith.select %24, %84, %82 : vector<2x8xi1>, vector<2x8xf32>
    %86 = arith.minimumf %78, %81 : vector<2x8xf32>
    %87 = arith.maximumf %78, %85 : vector<2x8xf32>
    %88 = arith.select %20, %86, %87 : vector<2x8xi1>, vector<2x8xf32>
    %cst_34 = arith.constant dense<0.000000e+00> : vector<2x8xf32>
    %89 = tpu.matmul %88, %31, %cst_34 {dimension_numbers = #tpu.dot_dimension_numbers<[1], [0], [0], [1], [0, 0, 1, 1], [], []>} : vector<2x8xf32>, vector<8x8xf32>, vector<2x8xf32> -> vector<2x8xf32>
    %cst_35 = arith.constant 1.000000e+30 : f32
    %90 = vector.broadcast %cst_35 : f32 to vector<2x8xf32>
    %91 = arith.select %22, %90, %89 : vector<2x8xi1>, vector<2x8xf32>
    %cst_36 = arith.constant dense<0.000000e+00> : vector<2x8xf32>
    %92 = tpu.matmul %88, %36, %cst_36 {dimension_numbers = #tpu.dot_dimension_numbers<[1], [0], [0], [1], [0, 0, 1, 1], [], []>} : vector<2x8xf32>, vector<8x8xf32>, vector<2x8xf32> -> vector<2x8xf32>
    %cst_37 = arith.constant 0.000000e+00 : f32
    %cst_38 = arith.constant 1.000000e+30 : f32
    %93 = arith.subf %cst_37, %cst_38 : f32
    %94 = vector.broadcast %93 : f32 to vector<2x8xf32>
    %95 = arith.select %24, %94, %92 : vector<2x8xi1>, vector<2x8xf32>
    %cst_39 = arith.constant dense<true> : vector<2x8xi1>
    %96 = arith.xori %20, %cst_39 : vector<2x8xi1>
    %97 = arith.minimumf %88, %91 : vector<2x8xf32>
    %98 = arith.maximumf %88, %95 : vector<2x8xf32>
    %99 = arith.select %96, %97, %98 : vector<2x8xi1>, vector<2x8xf32>
    %cst_40 = arith.constant dense<0.000000e+00> : vector<2x8xf32>
    %100 = tpu.matmul %99, %31, %cst_40 {dimension_numbers = #tpu.dot_dimension_numbers<[1], [0], [0], [1], [0, 0, 1, 1], [], []>} : vector<2x8xf32>, vector<8x8xf32>, vector<2x8xf32> -> vector<2x8xf32>
    %cst_41 = arith.constant 1.000000e+30 : f32
    %101 = vector.broadcast %cst_41 : f32 to vector<2x8xf32>
    %102 = arith.select %22, %101, %100 : vector<2x8xi1>, vector<2x8xf32>
    %cst_42 = arith.constant dense<0.000000e+00> : vector<2x8xf32>
    %103 = tpu.matmul %99, %36, %cst_42 {dimension_numbers = #tpu.dot_dimension_numbers<[1], [0], [0], [1], [0, 0, 1, 1], [], []>} : vector<2x8xf32>, vector<8x8xf32>, vector<2x8xf32> -> vector<2x8xf32>
    %cst_43 = arith.constant 0.000000e+00 : f32
    %cst_44 = arith.constant 1.000000e+30 : f32
    %104 = arith.subf %cst_43, %cst_44 : f32
    %105 = vector.broadcast %104 : f32 to vector<2x8xf32>
    %106 = arith.select %24, %105, %103 : vector<2x8xi1>, vector<2x8xf32>
    %107 = arith.minimumf %99, %102 : vector<2x8xf32>
    %108 = arith.maximumf %99, %106 : vector<2x8xf32>
    %109 = arith.select %20, %107, %108 : vector<2x8xi1>, vector<2x8xf32>
    %cst_45 = arith.constant dense<0.000000e+00> : vector<2x8xf32>
    %110 = tpu.matmul %109, %31, %cst_45 {dimension_numbers = #tpu.dot_dimension_numbers<[1], [0], [0], [1], [0, 0, 1, 1], [], []>} : vector<2x8xf32>, vector<8x8xf32>, vector<2x8xf32> -> vector<2x8xf32>
    %cst_46 = arith.constant 1.000000e+30 : f32
    %111 = vector.broadcast %cst_46 : f32 to vector<2x8xf32>
    %112 = arith.select %22, %111, %110 : vector<2x8xi1>, vector<2x8xf32>
    %cst_47 = arith.constant dense<0.000000e+00> : vector<2x8xf32>
    %113 = tpu.matmul %109, %36, %cst_47 {dimension_numbers = #tpu.dot_dimension_numbers<[1], [0], [0], [1], [0, 0, 1, 1], [], []>} : vector<2x8xf32>, vector<8x8xf32>, vector<2x8xf32> -> vector<2x8xf32>
    %cst_48 = arith.constant 0.000000e+00 : f32
    %cst_49 = arith.constant 1.000000e+30 : f32
    %114 = arith.subf %cst_48, %cst_49 : f32
    %115 = vector.broadcast %114 : f32 to vector<2x8xf32>
    %116 = arith.select %24, %115, %113 : vector<2x8xi1>, vector<2x8xf32>
    %cst_50 = arith.constant dense<true> : vector<2x8xi1>
    %117 = arith.xori %20, %cst_50 : vector<2x8xi1>
    %118 = arith.minimumf %109, %112 : vector<2x8xf32>
    %119 = arith.maximumf %109, %116 : vector<2x8xf32>
    %120 = arith.select %117, %118, %119 : vector<2x8xi1>, vector<2x8xf32>
    %c0_51 = arith.constant 0 : index
    %c0_52 = arith.constant 0 : index
    %121 = vector.load %arg3[%c0_51, %c0_52] : memref<3x8xf32, #tpu.memory_space<vmem>>, vector<3x8xf32>
    %c0_53 = arith.constant 0 : index
    %c0_54 = arith.constant 0 : index
    %c0_55 = arith.constant 0 : index
    %122 = vector.load %arg2[%c0_53, %c0_54, %c0_55] : memref<3x8x8xf32, #tpu.memory_space<vmem>>, vector<1x8x8xf32>
    %123 = vector.shape_cast %122 : vector<1x8x8xf32> to vector<8x8xf32>
    %cst_56 = arith.constant dense<0.000000e+00> : vector<2x8xf32>
    %124 = tpu.matmul %120, %123, %cst_56 {dimension_numbers = #tpu.dot_dimension_numbers<[1], [0], [0], [1], [0, 0, 1, 1], [], []>} : vector<2x8xf32>, vector<8x8xf32>, vector<2x8xf32> -> vector<2x8xf32>
    %125 = vector.extract_strided_slice %121 {offsets = [0, 0], sizes = [1, 8], strides = [1, 1]} : vector<3x8xf32> to vector<1x8xf32>
    %126 = vector.broadcast %125 : vector<1x8xf32> to vector<2x8xf32>
    %127 = arith.addf %124, %126 : vector<2x8xf32>
    %cst_57 = arith.constant 0.000000e+00 : f32
    %128 = vector.broadcast %cst_57 : f32 to vector<2x8xf32>
    %129 = arith.maximumf %127, %128 : vector<2x8xf32>
    %c1 = arith.constant 1 : index
    %c0_58 = arith.constant 0 : index
    %c0_59 = arith.constant 0 : index
    %130 = vector.load %arg2[%c1, %c0_58, %c0_59] : memref<3x8x8xf32, #tpu.memory_space<vmem>>, vector<1x8x8xf32>
    %131 = vector.shape_cast %130 : vector<1x8x8xf32> to vector<8x8xf32>
    %cst_60 = arith.constant dense<0.000000e+00> : vector<2x8xf32>
    %132 = tpu.matmul %129, %131, %cst_60 {dimension_numbers = #tpu.dot_dimension_numbers<[1], [0], [0], [1], [0, 0, 1, 1], [], []>} : vector<2x8xf32>, vector<8x8xf32>, vector<2x8xf32> -> vector<2x8xf32>
    %133 = vector.extract_strided_slice %121 {offsets = [1, 0], sizes = [1, 8], strides = [1, 1]} : vector<3x8xf32> to vector<1x8xf32>
    %134 = vector.broadcast %133 : vector<1x8xf32> to vector<2x8xf32>
    %135 = arith.addf %132, %134 : vector<2x8xf32>
    %cst_61 = arith.constant 0.000000e+00 : f32
    %136 = vector.broadcast %cst_61 : f32 to vector<2x8xf32>
    %137 = arith.maximumf %135, %136 : vector<2x8xf32>
    %c2 = arith.constant 2 : index
    %c0_62 = arith.constant 0 : index
    %c0_63 = arith.constant 0 : index
    %138 = vector.load %arg2[%c2, %c0_62, %c0_63] : memref<3x8x8xf32, #tpu.memory_space<vmem>>, vector<1x8x8xf32>
    %139 = vector.shape_cast %138 : vector<1x8x8xf32> to vector<8x8xf32>
    %cst_64 = arith.constant dense<0.000000e+00> : vector<2x8xf32>
    %140 = tpu.matmul %137, %139, %cst_64 {dimension_numbers = #tpu.dot_dimension_numbers<[1], [0], [0], [1], [0, 0, 1, 1], [], []>} : vector<2x8xf32>, vector<8x8xf32>, vector<2x8xf32> -> vector<2x8xf32>
    %141 = vector.extract_strided_slice %121 {offsets = [2, 0], sizes = [1, 8], strides = [1, 1]} : vector<3x8xf32> to vector<1x8xf32>
    %142 = vector.broadcast %141 : vector<1x8xf32> to vector<2x8xf32>
    %143 = arith.addf %140, %142 : vector<2x8xf32>
    %c0_65 = arith.constant 0 : index
    %c0_66 = arith.constant 0 : index
    %144 = vector.load %arg4[%c0_65, %c0_66] : memref<2x8xf32, #tpu.memory_space<vmem>>, vector<2x8xf32>
    tpu.vector_store %arg4[%c0_65, %c0_66], %143 {strides = array<i32>} : memref<2x8xf32, #tpu.memory_space<vmem>>, vector<2x8xf32>,
    return
  }
  func.func @transform_0(%arg0: i32) -> (i32, i32) {
    %c0_i32 = arith.constant 0 : i32
    %c0_i32_0 = arith.constant 0 : i32
    return %arg0, %c0_i32 : i32, i32
  }
  func.func @transform_1(%arg0: i32) -> (i32, i32, i32) {
    %c0_i32 = arith.constant 0 : i32
    %c0_i32_0 = arith.constant 0 : i32
    %c0_i32_1 = arith.constant 0 : i32
    %c0_i32_2 = arith.constant 0 : i32
    return %c0_i32, %c0_i32_0, %c0_i32_1 : i32, i32, i32
  }
  func.func @transform_2(%arg0: i32) -> (i32, i32) {
    %c0_i32 = arith.constant 0 : i32
    %c0_i32_0 = arith.constant 0 : i32
    %c0_i32_1 = arith.constant 0 : i32
    return %c0_i32, %c0_i32_0 : i32, i32
  }
  func.func @transform_3(%arg0: i32) -> (i32, i32) {
    %c0_i32 = arith.constant 0 : i32
    %c0_i32_0 = arith.constant 0 : i32
    return %arg0, %c0_i32 : i32, i32
  }
}

</mosaic_0001>

<bundles_post_ra>
// kernel: full_two_thinning_net.1
= control target key start
LH: loop header
LB: loop body
LE: loop exit
PB: predicated region body
PF: predicated region fallthrough
CT: control target
= control target key end

     0   :  { %8 = vsyncpa [#allocation3], 0  ;;  %s2044_s0 = inlined_call_operand.hbm [shape: s32[2,8], index: 0, kind: input, shape index: {}]   ;;  %s2045_s1 = inlined_call_operand.hbm [shape: f32[3,8,8], index: 1, kind: input, shape index: {}]   ;;  %s2046_s2 = inlined_call_operand.vmem [shape: f32[3,8], index: 2, kind: input, shape index: {}]   ;;  %s2047_s3 = inlined_call_operand.hbm [shape: f32[2,8], index: 3, kind: output, shape index: {}]  }
   0x1   :  { %9 = vsyncpa [#allocation6], 0 }
   0x2   :  { %10 = vsyncpa [#allocation4], 0  ;;  %s1765_s12 = smov [#allocation2]   ;;  %s1766_s14 = smov [#allocation5]  }
   0x3   :  { %s17_s13 = sshll.u32 %s1765_s12, 4  ;;  %s26_s15 = sshll.u32 %s1766_s14, 4  ;;  %s18_s13 = int_to_ptr.vmem [resolvable:$true] %s17_s13  ;;  %s1794_s15 = int_to_ptr.vmem [resolvable:$true] %s26_s15 }
   0x4   :  { %s1693_s18 = scalar_lea.hbm %s2044_s0, 32 }
   0x5   :  { %p1694_p0 = scmp.ne.s32.totalorder %s2044_s0, %s1693_s18  ;;  %p1697_p1 = scmp.lt.u32.totalorder %s1693_s18, %s2044_s0 }
   0x7   :  { %p1699_p2 = pnand %p1697_p1, %p1694_p0 }
   0x9   :  { %1702 = shalt.err (!%p1699_p2)
}
   0xa   :  { %s1703_s23 = scalar_lea.vmem %s18_s13, 32  ;;  %p1708_p4 = scmp.lt.s32.totalorder %s18_s13, %s18_s13 }
   0xb   :  { %p1704_p3 = scmp.ne.s32.totalorder %s18_s13, %s1703_s23  ;;  %p1709_p5 = scmp.lt.s32.totalorder %s1703_s23, %s1703_s23 }
   0xd   :  { %p1710_p6 = por %p1709_p5, %p1708_p4 }
   0xf   :  { %p1711_p7 = pnand %p1710_p6, %p1704_p3 }
  0x11   :  { %1714 = shalt.err (!%p1711_p7)
}
  0x12   :  { %20 = dma.hbm_to_vmem [thread:$0]  %s2044_s0, 32, %s18_s13, [#allocation3]  }
  0x13   :  { %s1715_s28 = scalar_lea.hbm %s2045_s1, 384 }
  0x14   :  { %p1716_p8 = scmp.ne.s32.totalorder %s2045_s1, %s1715_s28  ;;  %p1719_p9 = scmp.lt.u32.totalorder %s1715_s28, %s2045_s1 }
  0x16   :  { %p1721_p10 = pnand %p1719_p9, %p1716_p8 }
  0x18   :  { %1724 = shalt.err (!%p1721_p10)
}
  0x19   :  { %s1725_s6 = scalar_lea.vmem %s1794_s15, 384  ;;  %p1730_p12 = scmp.lt.s32.totalorder %s1794_s15, %s1794_s15 }
  0x1a   :  { %p1726_p11 = scmp.ne.s32.totalorder %s1794_s15, %s1725_s6  ;;  %p1731_p13 = scmp.lt.s32.totalorder %s1725_s6, %s1725_s6 }
  0x1c   :  { %p1732_p0 = por %p1731_p13, %p1730_p12 }
  0x1e   :  { %p1733_p1 = pnand %p1732_p0, %p1726_p11 }
  0x20   :  { %1736 = shalt.err (!%p1733_p1)
}
  0x21   :  { %s1767_s0 = smov 128   ;;  %s1768_s7 = smov 8  }
  0x22   :  { %32 = dma.hbm_to_vmem [thread:$0]  %s2045_s1, 384, %s1794_s15, [#allocation6], %s1767_s0, %s1767_s0, %s1768_s7  }
  0x23   :  { %1759 = dma.done.wait [#allocation3], 32  }
  0x24   :  { %1760 = vsyncadd [#allocation3], 4294967264 }
  0x25   :  { %1761 = dma.done.wait [#allocation6], 384  }
  0x26   :  { %1762 = vsyncadd [#allocation6], 4294966912  ;;  %v43_v0 = vlaneseq  ;;  %v1769_v1 = vmov 0.0   ;;  %vm1770_vm0 = vmmov 0   ;;  %v1771_v8 = vmov 1.0   ;;  %v1417_v28 = vld [vmem:[#allocation5 + $0x10] sm:$0xff] }
  0x27   :  { %1589 = vmatprep.subr.mxu0 %v1769_v1  ;;  %1594 = vmatprep.subr.mxu1 %v1769_v1  ;;  %v41_v9 = vld [vmem:[#allocation2] sm:$0x3]  ;;  %vm70_vm3 = vcmask 64512   ;;  %vm1772_vm7 = vmmov 1   ;;  %vm1495_vm9 = vcmask 58368  }
  0x28   :  { %v1827_v2 = vand.u32 127, %v43_v0  ;;  %v1829_v3 = vshrl.u32 %v43_v0, 7  ;;  %1591 = vmatprep.mubr.msk.f32.mxu0 %vm1770_vm0, %v1769_v1  ;;  %1596 = vmatprep.mubr.msk.f32.mxu1 %vm1770_vm0, %v1769_v1  ;;  %v42_v10 = vcvt.s32.f32 %v41_v9 }
  0x2a   :  { %v62_v4 = vadd.s32 1, %v1827_v2  ;;  %v1514_v5 = vadd.s32 4294967295, %v1827_v2  ;;  %v49_v11 = vand.u32 1, %v1827_v2  ;;  %vm58_vm4 = vcmp.eq.s32.totalorder %v1827_v2, 7 }
  0x2b   :  { %vm59_vm5 = vcmp.eq.s32.totalorder %v1827_v2, 0  ;;  %v1256_v2 = vld [vmem:[%s2046_s2] sm:$0x7]  ;;  %s1773_s2 = smov [#allocation7]  }
  0x2c   :  { %vm1838_vm1 = vcmp.eq.s32.totalorder %v1829_v3, %v62_v4  ;;  %vm1843_vm2 = vcmp.eq.s32.totalorder %v1829_v3, %v1514_v5  ;;  %vm1872_vm6 = vcmp.eq.s32.totalorder %v49_v11, 0  ;;  %s1503_s11 = sshll.u32 %s1773_s2, 4  ;;  %s1504_s11 = int_to_ptr.vmem [resolvable:$true] %s1503_s11 }
  0x2d   :  { %1590 = vmatpush3.msk.msra.mxu0 %vm1838_vm1, %v1771_v8  ;;  %1595 = vmatpush3.msk.msra.mxu1 %vm1843_vm2, %v1771_v8  ;;  %vm1902_vm8 = vmxor %vm1872_vm6, %vm1772_vm7  ;;  %s1737_s12 = scalar_lea.vmem %s1504_s11, 32  ;;  %p1742_p3 = scmp.lt.s32.totalorder %s1504_s11, %s1504_s11 }
  0x2e   :  { %1599 = vmatprep.subr.mxu0 %v1769_v1  ;;  %1604 = vmatprep.subr.mxu1 %v1769_v1  ;;  %p1738_p2 = scmp.ne.s32.totalorder %s1504_s11, %s1737_s12  ;;  %p1743_p4 = scmp.lt.s32.totalorder %s1737_s12, %s1737_s12 }
  0x2f   :  { %1592 = vmatmul.mubr.msk.f32.vlgmr.msra.gmra.mrb[0].mxu0 %vm70_vm3, %v42_v10  ;;  %1597 = vmatmul.mubr.msk.f32.vlgmr.msra.gmra.mrb[0].mxu1 %vm70_vm3, %v42_v10 }
  0x30   :  { %1600 = vmatpush3.msk.msra.mxu0 %vm1838_vm1, %v1771_v8  ;;  %1605 = vmatpush3.msk.msra.mxu1 %vm1843_vm2, %v1771_v8  ;;  %p1744_p5 = por %p1743_p4, %p1742_p3 }
  0x31   :  { %1601 = vmatprep.mubr.msk.f32.mxu0 %vm1770_vm0, %v1769_v1  ;;  %1606 = vmatprep.mubr.msk.f32.mxu1 %vm1770_vm0, %v1769_v1 }
  0x32   :  { %1609 = vmatprep.subr.mxu0 %v1769_v1  ;;  %1614 = vmatprep.subr.mxu1 %v1769_v1  ;;  %p1745_p6 = pnand %p1744_p5, %p1738_p2 }
 0x102   :  { %v140_v12 = vpop.f32.mrb[0].mxu0  ;;  %v211_v13 = vpop.f32.mrb[0].mxu1 }
 0x103   :  { %v144_v15 = vsel %vm58_vm4, 1e+30, %v140_v12  ;;  %v215_v16 = vsel %vm59_vm5, -1e+30, %v211_v13  ;;  %v1593_v17 = vpop.f32.mrb[1].mxu0  ;;  %v1598_v18 = vpop.f32.mrb[1].mxu1 }
 0x104   :  { %v216_v19 = vmin.f32 %v42_v10, %v144_v15  ;;  %v217_v20 = vmax.f32 %v42_v10, %v215_v16  ;;  %v1257_v17 = vld [vmem:[#allocation5] sm:$0xff] }
 0x106   :  { %v218_v21 = vsel %vm1872_vm6, %v216_v19, %v217_v20 }
 0x107   :  { %1602 = vmatmul.mubr.msk.f32.vlgmr.msra.gmra.mrb[2].mxu0 %vm70_vm3, %v218_v21  ;;  %1607 = vmatmul.mubr.msk.f32.vlgmr.msra.gmra.mrb[2].mxu1 %vm70_vm3, %v218_v21 }
 0x108   :  { %1610 = vmatpush3.msk.msra.mxu0 %vm1838_vm1, %v1771_v8  ;;  %1615 = vmatpush3.msk.msra.mxu1 %vm1843_vm2, %v1771_v8 }
 0x109   :  { %1611 = vmatprep.mubr.msk.f32.mxu0 %vm1770_vm0, %v1769_v1  ;;  %1616 = vmatprep.mubr.msk.f32.mxu1 %vm1770_vm0, %v1769_v1 }
 0x10a   :  { %1619 = vmatprep.subr.mxu0 %v1769_v1  ;;  %1624 = vmatprep.subr.mxu1 %v1769_v1 }
 0x1da   :  { %v288_v22 = vpop.f32.mrb[2].mxu0  ;;  %v359_v23 = vpop.f32.mrb[2].mxu1 }
 0x1db   :  { %v292_v24 = vsel %vm58_vm4, 1e+30, %v288_v22  ;;  %v363_v25 = vsel %vm59_vm5, -1e+30, %v359_v23  ;;  %v1603_v26 = vpop.f32.mrb[3].mxu0  ;;  %v1608_v27 = vpop.f32.mrb[3].mxu1 }
 0x1dc   :  { %v365_v29 = vmin.f32 %v218_v21, %v292_v24  ;;  %v366_v30 = vmax.f32 %v218_v21, %v363_v25  ;;  %v1337_v26 = vld [vmem:[#allocation5 + $0x8] sm:$0xff]  ;;  %v1260_v27 = vsub.s32 0, %v1829_v3 }
 0x1de   :  { %v367_v31 = vsel %vm1902_vm8, %v365_v29, %v366_v30  ;;  %v1261_v29 = vrot.slane %v1256_v2, %v1260_v27 }
 0x1df   :  { %1612 = vmatmul.mubr.msk.f32.vlgmr.msra.gmra.mrb[4].mxu0 %vm70_vm3, %v367_v31  ;;  %1617 = vmatmul.mubr.msk.f32.vlgmr.msra.gmra.mrb[4].mxu1 %vm70_vm3, %v367_v31 }
 0x1e0   :  { %1620 = vmatpush3.msk.msra.mxu0 %vm1838_vm1, %v1771_v8  ;;  %1625 = vmatpush3.msk.msra.mxu1 %vm1843_vm2, %v1771_v8 }
 0x1e1   :  { %1621 = vmatprep.mubr.msk.f32.mxu0 %vm1770_vm0, %v1769_v1  ;;  %1626 = vmatprep.mubr.msk.f32.mxu1 %vm1770_vm0, %v1769_v1 }
 0x1e2   :  { %1629 = vmatprep.subr.mxu0 %v1769_v1  ;;  %1634 = vmatprep.subr.mxu1 %v1769_v1 }
 0x2b2   :  { %v437_v32 = vpop.f32.mrb[4].mxu0  ;;  %v508_v33 = vpop.f32.mrb[4].mxu1 }
 0x2b3   :  { %v441_v34 = vsel %vm58_vm4, 1e+30, %v437_v32  ;;  %v512_v35 = vsel %vm59_vm5, -1e+30, %v508_v33  ;;  %v1613_v36 = vpop.f32.mrb[5].mxu0  ;;  %v1618_v37 = vpop.f32.mrb[5].mxu1 }
 0x2b4   :  { %v513_v38 = vmin.f32 %v367_v31, %v441_v34  ;;  %v514_v39 = vmax.f32 %v367_v31, %v512_v35  ;;  %v1340_v34 = vsub.s32 1, %v1829_v3 }
 0x2b6   :  { %v515_v40 = vsel %vm1872_vm6, %v513_v38, %v514_v39  ;;  %v1420_v39 = vsub.s32 2, %v1829_v3 }
 0x2b7   :  { %1622 = vmatmul.mubr.msk.f32.vlgmr.msra.gmra.mrb[6].mxu0 %vm70_vm3, %v515_v40  ;;  %1627 = vmatmul.mubr.msk.f32.vlgmr.msra.gmra.mrb[6].mxu1 %vm70_vm3, %v515_v40 }
 0x2b8   :  { %1630 = vmatpush3.msk.msra.mxu0 %vm1838_vm1, %v1771_v8  ;;  %1635 = vmatpush3.msk.msra.mxu1 %vm1843_vm2, %v1771_v8 }
 0x2b9   :  { %1631 = vmatprep.mubr.msk.f32.mxu0 %vm1770_vm0, %v1769_v1  ;;  %1636 = vmatprep.mubr.msk.f32.mxu1 %vm1770_vm0, %v1769_v1 }
 0x2ba   :  { %1639 = vmatprep.subr.mxu0 %v1769_v1  ;;  %1644 = vmatprep.subr.mxu1 %v1769_v1 }
 0x38a   :  { %v585_v41 = vpop.f32.mrb[6].mxu0  ;;  %v656_v42 = vpop.f32.mrb[6].mxu1 }
 0x38b   :  { %v589_v43 = vsel %vm58_vm4, 1e+30, %v585_v41  ;;  %v660_v44 = vsel %vm59_vm5, -1e+30, %v656_v42  ;;  %v1623_v45 = vpop.f32.mrb[7].mxu0  ;;  %v1628_v46 = vpop.f32.mrb[7].mxu1 }
 0x38c   :  { %v661_v47 = vmin.f32 %v515_v40, %v589_v43  ;;  %v662_v48 = vmax.f32 %v515_v40, %v660_v44  ;;  %v1421_v40 = vrot.slane %v1256_v2, %v1420_v39 }
 0x38e   :  { %v663_v49 = vsel %vm1902_vm8, %v661_v47, %v662_v48 }
 0x38f   :  { %1632 = vmatmul.mubr.msk.f32.vlgmr.msra.gmra.mrb[8].mxu0 %vm70_vm3, %v663_v49  ;;  %1637 = vmatmul.mubr.msk.f32.vlgmr.msra.gmra.mrb[8].mxu1 %vm70_vm3, %v663_v49 }
 0x390   :  { %1640 = vmatpush3.msk.msra.mxu0 %vm1838_vm1, %v1771_v8  ;;  %1645 = vmatpush3.msk.msra.mxu1 %vm1843_vm2, %v1771_v8 }
 0x391   :  { %1641 = vmatprep.mubr.msk.f32.mxu0 %vm1770_vm0, %v1769_v1  ;;  %1646 = vmatprep.mubr.msk.f32.mxu1 %vm1770_vm0, %v1769_v1 }
 0x392   :  { %1649 = vmatprep.subr.mxu0 %v1769_v1  ;;  %1654 = vmatprep.subr.mxu1 %v1769_v1 }
 0x462   :  { %v733_v50 = vpop.f32.mrb[8].mxu0  ;;  %v804_v51 = vpop.f32.mrb[8].mxu1 }
 0x463   :  { %v737_v52 = vsel %vm58_vm4, 1e+30, %v733_v50  ;;  %v808_v53 = vsel %vm59_vm5, -1e+30, %v804_v51  ;;  %v1633_v54 = vpop.f32.mrb[9].mxu0  ;;  %v1638_v55 = vpop.f32.mrb[9].mxu1 }
 0x464   :  { %v809_v56 = vmin.f32 %v663_v49, %v737_v52  ;;  %v810_v57 = vmax.f32 %v663_v49, %v808_v53 }
 0x466   :  { %v811_v58 = vsel %vm1872_vm6, %v809_v56, %v810_v57 }
 0x467   :  { %1642 = vmatmul.mubr.msk.f32.vlgmr.msra.gmra.mrb[10].mxu0 %vm70_vm3, %v811_v58  ;;  %1647 = vmatmul.mubr.msk.f32.vlgmr.msra.gmra.mrb[10].mxu1 %vm70_vm3, %v811_v58 }
 0x468   :  { %1650 = vmatpush3.msk.msra.mxu0 %vm1838_vm1, %v1771_v8  ;;  %1655 = vmatpush3.msk.msra.mxu1 %vm1843_vm2, %v1771_v8 }
 0x469   :  { %1651 = vmatprep.mubr.msk.f32.mxu0 %vm1770_vm0, %v1769_v1  ;;  %1656 = vmatprep.mubr.msk.f32.mxu1 %vm1770_vm0, %v1769_v1 }
 0x46a   :  { %1659 = vmatprep.subr.mxu0 %v1769_v1  ;;  %1664 = vmatprep.subr.mxu1 %v1769_v1 }
 0x53a   :  { %v881_v59 = vpop.f32.mrb[10].mxu0  ;;  %v952_v60 = vpop.f32.mrb[10].mxu1 }
 0x53b   :  { %v885_v61 = vsel %vm58_vm4, 1e+30, %v881_v59  ;;  %v956_v62 = vsel %vm59_vm5, -1e+30, %v952_v60  ;;  %v1643_v63 = vpop.f32.mrb[11].mxu0  ;;  %v1648_v0 = vpop.f32.mrb[11].mxu1 }
 0x53c   :  { %v957_v4 = vmin.f32 %v811_v58, %v885_v61  ;;  %v958_v5 = vmax.f32 %v811_v58, %v956_v62 }
 0x53e   :  { %v959_v9 = vsel %vm1902_vm8, %v957_v4, %v958_v5 }
 0x53f   :  { %1652 = vmatmul.mubr.msk.f32.vlgmr.msra.gmra.mrb[12].mxu0 %vm70_vm3, %v959_v9  ;;  %1657 = vmatmul.mubr.msk.f32.vlgmr.msra.gmra.mrb[12].mxu1 %vm70_vm3, %v959_v9 }
 0x540   :  { %1660 = vmatpush3.msk.msra.mxu0 %vm1838_vm1, %v1771_v8  ;;  %1665 = vmatpush3.msk.msra.mxu1 %vm1843_vm2, %v1771_v8 }
 0x541   :  { %1661 = vmatprep.mubr.msk.f32.mxu0 %vm1770_vm0, %v1769_v1  ;;  %1666 = vmatprep.mubr.msk.f32.mxu1 %vm1770_vm0, %v1769_v1 }
 0x542   :  { %1669 = vmatprep.subr.mxu0 %v1769_v1  ;;  %1674 = vmatprep.subr.mxu1 %v1769_v1 }
 0x612   :  { %v1029_v10 = vpop.f32.mrb[12].mxu0  ;;  %v1100_v11 = vpop.f32.mrb[12].mxu1 }
 0x613   :  { %v1033_v6 = vsel %vm58_vm4, 1e+30, %v1029_v10  ;;  %v1104_v12 = vsel %vm59_vm5, -1e+30, %v1100_v11  ;;  %v1653_v7 = vpop.f32.mrb[13].mxu0  ;;  %v1658_v8 = vpop.f32.mrb[13].mxu1 }
 0x614   :  { %v1105_v13 = vmin.f32 %v959_v9, %v1033_v6  ;;  %v1106_v15 = vmax.f32 %v959_v9, %v1104_v12 }
 0x616   :  { %v1107_v16 = vsel %vm1872_vm6, %v1105_v13, %v1106_v15 }
 0x617   :  { %1662 = vmatmul.mubr.msk.f32.vlgmr.msra.gmra.mrb[14].mxu0 %vm70_vm3, %v1107_v16  ;;  %1667 = vmatmul.mubr.msk.f32.vlgmr.msra.gmra.mrb[14].mxu1 %vm70_vm3, %v1107_v16 }
 0x618   :  { %1671 = vmatprep.mubr.msk.f32.mxu0 %vm1770_vm0, %v1769_v1  ;;  %1676 = vmatprep.mubr.msk.f32.mxu1 %vm1770_vm0, %v1769_v1 }
 0x619   :  { %1670 = vmatpush3.msra.mxu0 %v1257_v17  ;;  %1675 = vmatpush3.msra.mxu1 %v1337_v26 }
 0x61a   :  { %1679 = vmatprep.subr.mxu0 %v1769_v1 }
 0x6ea   :  { %v1177_v18 = vpop.f32.mrb[14].mxu0  ;;  %v1248_v19 = vpop.f32.mrb[14].mxu1 }
 0x6eb   :  { %v1181_v14 = vsel %vm58_vm4, 1e+30, %v1177_v18  ;;  %v1252_v20 = vsel %vm59_vm5, -1e+30, %v1248_v19  ;;  %v1663_v21 = vpop.f32.mrb[15].mxu0  ;;  %v1668_v22 = vpop.f32.mrb[15].mxu1 }
 0x6ec   :  { %v1253_v23 = vmin.f32 %v1107_v16, %v1181_v14  ;;  %v1254_v24 = vmax.f32 %v1107_v16, %v1252_v20 }
 0x6ee   :  { %v1255_v25 = vsel %vm1902_vm8, %v1253_v23, %v1254_v24 }
 0x6ef   :  { %1672 = vmatmul.mubr.msk.f32.vlgmr.msra.gmra.mrb[16].mxu0 %vm70_vm3, %v1255_v25 }
 0x6f0   :  { %1681 = vmatprep.mubr.msk.f32.mxu0 %vm1770_vm0, %v1769_v1  ;;  %1680 = vmatpush3.msra.mxu0 %v1417_v28  ;;  %v1341_v1 = vrot.slane %v1256_v2, %v1340_v34 }
 0x7c2   :  { %v1331_v30 = vpop.f32.mrb[16].mxu0 }
 0x7c3   :  { %v1332_v31 = vadd.f32 %v1331_v30, %v1261_v29  ;;  %v1673_v32 = vpop.f32.mrb[17].mxu0 }
 0x7c5   :  { %v1335_v33 = vmax.f32 %v1332_v31, 0.0 }
 0x7c7   :  { %1677 = vmatmul.mubr.msk.f32.vlgmr.msra.gmra.mrb[16].mxu1 %vm70_vm3, %v1335_v33 }
 0x89a   :  { %v1411_v35 = vpop.f32.mrb[16].mxu1 }
 0x89b   :  { %v1412_v36 = vadd.f32 %v1411_v35, %v1341_v1  ;;  %v1678_v37 = vpop.f32.mrb[17].mxu1 }
 0x89d   :  { %v1415_v38 = vmax.f32 %v1412_v36, 0.0 }
 0x89f   :  { %1682 = vmatmul.mubr.msk.f32.vlgmr.msra.gmra.mrb[18].mxu0 %vm70_vm3, %v1415_v38 }
 0x972   :  { %v1491_v41 = vpop.f32.mrb[18].mxu0 }
 0x973   :  { %v1492_v42 = vadd.f32 %v1491_v41, %v1421_v40  ;;  %v1683_v43 = vpop.f32.mrb[19].mxu0 }
 0x975   :  { %1496 = vst.msk [vmem:[#allocation7] sm:$0x3] %vm1495_vm9, %v1492_v42 }
 0x976   :  { %1748 = shalt.err (!%p1745_p6)
}
 0x977   :  { %s1749_s15 = scalar_lea.hbm %s2047_s3, 32 }
 0x978   :  { %p1750_p7 = scmp.ne.s32.totalorder %s2047_s3, %s1749_s15  ;;  %p1753_p8 = scmp.lt.u32.totalorder %s1749_s15, %s2047_s3 }
 0x97a   :  { %p1755_p9 = pnand %p1753_p8, %p1750_p7 }
 0x97c   :  { %1758 = shalt.err (!%p1755_p9)
}
 0x97d   :  { %1506 = dma.vmem_to_hbm [thread:$0]  %s1504_s11, 32, %s2047_s3, [#allocation4]  }
 0x97e   :  { %1763 = dma.done.wait [#allocation4], 32  }
 0x97f   :  { %1764 = vsyncadd [#allocation4], 4294967264 }
 0x980   :  { %1510 = vsyncpa [#allocation3], 1 }
 0x981   :  { %1511 = vsyncpa [#allocation6], 1 }
 0x982   :  { %1512 = vsyncpa [#allocation4], 1 }

</bundles_post_ra>
